<compile_context>
chip_gen: v6e
topology: v6e:2x2x1
jax: 0.10.0
libtpu: 0.0.40
codegen_flags: <defaults>
</compile_context>

<pallas_src>
import functools

import jax
import jax.numpy as jnp
from jax.experimental import pallas as pl
from jax.experimental.pallas import tpu as pltpu


DATASET_CONFIGS = {
    "tg": (164980, [(958, "sigmoid"), (14136, "softmax"), (768, None), (768, None)]),
    "bt": (121293, [(657, "sigmoid"), (13189, "softmax"), (768, None), (768, None)]),
    "so": (194717, [(3036, "sigmoid"), (14164, "softmax"), (768, None), (768, None)]),
}

# N-tile for the big (item-vocab) embedding-tied projection.  bf16 weight tile
# 16384*64*2 = 2 MB + (16, 16384) f32 output tile = 1 MB; ~6 MB double-buffered
# fits v5e's 16 MiB default scoped VMEM (v6e/v7x could go to 32768 with
# vmem_limit_bytes; 16384 kept for portability across generations).
ITEM_TILE_N = 16384
# Tables at or below this width run as a single full-extent block (no padding,
# no partial stores, no post-kernel slice).
TIED_SINGLE_BLOCK_MAX = 16384


def _round_up(x, m):
    return (x + m - 1) // m * m


def _pad_rows(w, multiple):
    """Pad rows of w up to a multiple (init-time only; padded rows are zero)."""
    n = w.shape[0]
    n_pad = _round_up(n, multiple)
    if n_pad == n:
        return w
    return jnp.zeros((n_pad,) + w.shape[1:], w.dtype).at[:n].set(w)


# ----------------------------------------------------------------------------
# Single-block linear kernel:  out = x @ w + b     (everything fits in VMEM)
# ----------------------------------------------------------------------------
def _linear_kernel(x_ref, w_ref, b_ref, o_ref):
    w = w_ref[...]
    acc = jnp.dot(x_ref[...].astype(w.dtype), w, preferred_element_type=jnp.float32)
    o_ref[...] = (acc + b_ref[...]).astype(o_ref.dtype)


def linear_full(x, w, b):
    """x: (M, K) f32, w: (K, N) f32/bf16, b: (N,) f32  ->  (M, N) f32."""
    x = x.astype(jnp.float32)
    M, K = x.shape
    K2, N = w.shape
    assert K == K2
    b2 = b.reshape(1, N).astype(jnp.float32)
    return pl.pallas_call(
        _linear_kernel,
        out_shape=jax.ShapeDtypeStruct((M, N), jnp.float32),
        grid_spec=pltpu.PrefetchScalarGridSpec(
            num_scalar_prefetch=0,
            grid=(1,),
            in_specs=[
                pl.BlockSpec((M, K), lambda i: (0, 0)),
                pl.BlockSpec((K, N), lambda i: (0, 0)),
                pl.BlockSpec((1, N), lambda i: (0, 0)),
            ],
            out_specs=pl.BlockSpec((M, N), lambda i: (0, 0)),
        ),
        compiler_params=pltpu.CompilerParams(dimension_semantics=("arbitrary",)),
    )(x, w, b2)


# ----------------------------------------------------------------------------
# Stacked linear kernel: G independent (M,K)@(K,N)+b problems in ONE call
# (grid over the stack axis; used for the pairs of 768-dim dense fields).
# ----------------------------------------------------------------------------
def _linear_stacked_kernel(x_ref, w_ref, b_ref, o_ref):
    w = w_ref[0]
    acc = jnp.dot(x_ref[0].astype(w.dtype), w, preferred_element_type=jnp.float32)
    o_ref[0] = (acc + b_ref[0]).astype(o_ref.dtype)


def linear_stacked(xs, ws, bs):
    """xs: (G,M,K) f32, ws: (G,K,N), bs: (G,1,N) f32  ->  (G,M,N) f32."""
    xs = xs.astype(jnp.float32)
    bs = bs.astype(jnp.float32)
    G, M, K = xs.shape
    _, K2, N = ws.shape
    assert K == K2
    return pl.pallas_call(
        _linear_stacked_kernel,
        out_shape=jax.ShapeDtypeStruct((G, M, N), jnp.float32),
        grid_spec=pltpu.PrefetchScalarGridSpec(
            num_scalar_prefetch=0,
            grid=(G,),
            in_specs=[
                pl.BlockSpec((1, M, K), lambda g: (g, 0, 0)),
                pl.BlockSpec((1, K, N), lambda g: (g, 0, 0)),
                pl.BlockSpec((1, 1, N), lambda g: (g, 0, 0)),
            ],
            out_specs=pl.BlockSpec((1, M, N), lambda g: (g, 0, 0)),
        ),
        compiler_params=pltpu.CompilerParams(dimension_semantics=("parallel",)),
    )(xs, ws, bs)


# ----------------------------------------------------------------------------
# Embedding-tied output projection:  out = x @ w_nk[:n_valid].T
#   w_nk is stored (N, K) in the natural embedding layout; contraction is on
#   the last axis of both operands, so no transpose is ever materialized.
#   The output shape is EXACT (M, n_valid):
#     - small tables: one full-extent block (no padding, no masking)
#     - item table:   tiled over N; weight rows are zero-padded at init so all
#       weight reads stay in bounds, the final partial output block is a
#       masked store.
# ----------------------------------------------------------------------------
def _tied_proj_kernel(x_ref, w_ref, o_ref):
    w = w_ref[...]
    o_ref[...] = jax.lax.dot_general(
        x_ref[...].astype(w.dtype), w, (((1,), (1,)), ((), ())),
        preferred_element_type=jnp.float32).astype(o_ref.dtype)


def tied_output_proj(x, w_nk, n_valid):
    """x: (M, K) f32, w_nk: (N_rows, K) bf16 (N_rows >= n_valid).

    Returns (M, n_valid) f32 == x @ w_nk[:n_valid].T  (no bias: tied output).
    """
    x = x.astype(jnp.float32)
    M, K = x.shape
    N_rows, K2 = w_nk.shape
    assert K == K2 and N_rows >= n_valid

    if n_valid <= TIED_SINGLE_BLOCK_MAX:
        assert N_rows == n_valid, "small tied tables are stored unpadded"
        grid = (1,)
        in_specs = [
            pl.BlockSpec((M, K), lambda j: (0, 0)),
            pl.BlockSpec((n_valid, K), lambda j: (0, 0)),
        ]
        out_spec = pl.BlockSpec((M, n_valid), lambda j: (0, 0))
        semantics = ("arbitrary",)
    else:
        assert N_rows % ITEM_TILE_N == 0, "item table row-padded at init"
        grid = (N_rows // ITEM_TILE_N,)
        in_specs = [
            pl.BlockSpec((M, K), lambda j: (0, 0)),
            pl.BlockSpec((ITEM_TILE_N, K), lambda j: (j, 0)),
        ]
        # Exact output width: the final block is partial -> masked writeback.
        out_spec = pl.BlockSpec((M, ITEM_TILE_N), lambda j: (0, j))
        semantics = ("parallel",)

    return pl.pallas_call(
        _tied_proj_kernel,
        out_shape=jax.ShapeDtypeStruct((M, n_valid), jnp.float32),
        grid_spec=pltpu.PrefetchScalarGridSpec(
            num_scalar_prefetch=0,
            grid=grid,
            in_specs=in_specs,
            out_specs=out_spec,
        ),
        compiler_params=pltpu.CompilerParams(dimension_semantics=semantics),
    )(x, w_nk)


# ----------------------------------------------------------------------------
# Fused stack of TransformerEncoderLayers (post-norm, 4 heads, GELU FFN).
# All layers' weights are stacked on a leading layer axis and kept in VMEM; x
# stays resident across layers, so 3 layers cost one kernel launch and one HBM
# round-trip of the activations.
# ----------------------------------------------------------------------------
def _encoder_stack_kernel(x_ref, mask_ref,
                          wqkv_ref, bqkv_ref, wo_ref, bo_ref,
                          ln1g_ref, ln1b_ref,
                          w1_ref, b1_ref, w2_ref, b2_ref,
                          ln2g_ref, ln2b_ref,
                          o_ref, *, num_heads, num_layers):
    x = x_ref[0]                       # (L, E) f32 residual stream
    mask = mask_ref[0]                 # (1, L), 1.0 == padded key
    L, E = x.shape
    hd = E // num_heads
    scale = 1.0 / (hd ** 0.5)
    # TODO(synk): PyTorch masks padded keys with -inf (fully-padded rows give
    # NaN there); -1e9 keeps numerics finite and matches un-padded rows.
    key_bias = mask * (-1e9)

    def layer_norm(y, g, b):
        mu = jnp.mean(y, axis=-1, keepdims=True)
        var = jnp.mean((y - mu) ** 2, axis=-1, keepdims=True)
        return (y - mu) * jax.lax.rsqrt(var + 1e-5) * g + b

    for l in range(num_layers):
        # ---- self-attention (fused QKV, bf16 weights, f32 accumulation) ----
        qkv = jnp.dot(x.astype(jnp.bfloat16), wqkv_ref[l],
                      preferred_element_type=jnp.float32) + bqkv_ref[l]
        q = qkv[:, 0:E]
        k = qkv[:, E:2 * E]
        v = qkv[:, 2 * E:3 * E]

        ctx_parts = []
        for h in range(num_heads):
            sl = slice(h * hd, (h + 1) * hd)
            s = jax.lax.dot_general(q[:, sl], k[:, sl], (((1,), (1,)), ((), ())),
                                    preferred_element_type=jnp.float32)
            s = s * scale + key_bias
            s = s - jnp.max(s, axis=-1, keepdims=True)
            p = jnp.exp(s)
            p = p / jnp.sum(p, axis=-1, keepdims=True)
            ctx_parts.append(jnp.dot(p, v[:, sl],
                                     preferred_element_type=jnp.float32))
        ctx = jnp.concatenate(ctx_parts, axis=-1)          # (L, E)
        attn_out = jnp.dot(ctx.astype(jnp.bfloat16), wo_ref[l],
                           preferred_element_type=jnp.float32) + bo_ref[l]

        x = layer_norm(x + attn_out, ln1g_ref[l], ln1b_ref[l])

        # ---- feed-forward ----
        h1 = jnp.dot(x.astype(jnp.bfloat16), w1_ref[l],
                     preferred_element_type=jnp.float32) + b1_ref[l]
        # TODO(synk): PyTorch F.gelu default is exact (erf) GELU; tanh approx
        # used for guaranteed Mosaic lowering (difference < 1e-3).
        h1 = jax.nn.gelu(h1, approximate=True)
        ff = jnp.dot(h1.astype(jnp.bfloat16), w2_ref[l],
                     preferred_element_type=jnp.float32) + b2_ref[l]

        x = layer_norm(x + ff, ln2g_ref[l], ln2b_ref[l])

    o_ref[0] = x.astype(o_ref.dtype)


def encoder_stack(x, pad_mask, enc, num_heads=4):
    """x: (B, L, E) f32, pad_mask: (B, L) {0,1}, enc: stacked layer params."""
    B, L, E = x.shape
    LNUM = enc["w_qkv"].shape[0]
    H = enc["w1"].shape[2]
    mask3 = pad_mask.astype(jnp.float32).reshape(B, 1, L)

    def full(shape):
        return pl.BlockSpec(shape, lambda b, _n=len(shape): (0,) * _n)

    in_specs = [
        pl.BlockSpec((1, L, E), lambda b: (b, 0, 0)),       # x
        pl.BlockSpec((1, 1, L), lambda b: (b, 0, 0)),       # key-padding mask
        full((LNUM, E, 3 * E)), full((LNUM, 1, 3 * E)),     # fused QKV
        full((LNUM, E, E)), full((LNUM, 1, E)),             # out proj
        full((LNUM, 1, E)), full((LNUM, 1, E)),             # LN1
        full((LNUM, E, H)), full((LNUM, 1, H)),             # FFN 1
        full((LNUM, H, E)), full((LNUM, 1, E)),             # FFN 2
        full((LNUM, 1, E)), full((LNUM, 1, E)),             # LN2
    ]
    return pl.pallas_call(
        functools.partial(_encoder_stack_kernel,
                          num_heads=num_heads, num_layers=LNUM),
        out_shape=jax.ShapeDtypeStruct((B, L, E), jnp.float32),
        grid_spec=pltpu.PrefetchScalarGridSpec(
            num_scalar_prefetch=0,
            grid=(B,),
            in_specs=in_specs,
            out_specs=pl.BlockSpec((1, L, E), lambda b: (b, 0, 0)),
        ),
        compiler_params=pltpu.CompilerParams(
            # batch axis is fully independent -> shard across v7x's two TCs
            dimension_semantics=("parallel",),
        ),
    )(x.astype(jnp.float32), mask3,
      enc["w_qkv"], enc["b_qkv"], enc["wo"], enc["bo"],
      enc["ln1_g"], enc["ln1_b"], enc["w1"], enc["b1"],
      enc["w2"], enc["b2"], enc["ln2_g"], enc["ln2_b"])


# ----------------------------------------------------------------------------
# Parameter init (deterministic, synthetic).
#   - item table: bf16, row-padded ONCE to a multiple of ITEM_TILE_N
#   - categorical field tables: bf16, unpadded (single-block tied projection,
#     the SAME array is shared by the input and output projections)
#   - dense fields: input/output Linear weights pre-stacked per dim group so
#     both fields run in one pallas_call each
#   - encoder: weights stacked over layers; matmul weights bf16, LN/bias f32
# ----------------------------------------------------------------------------
def init_params(key, dataset="tg", emb_size=64, layer_num=3):
    item_num, feature_fields = DATASET_CONFIGS[dataset]
    ctr = [0]

    def nrm(shape, scale=0.02):
        ctr[0] += 1
        return scale * jax.random.normal(jax.random.fold_in(key, ctr[0]),
                                         shape, jnp.float32)

    E = emb_size
    params = {
        "item_emb": _pad_rows(nrm((item_num, E)).astype(jnp.bfloat16), ITEM_TILE_N),
        "pos_emb": nrm((100, E)),
        "field_emb": nrm((len(feature_fields) + 1, E)),
        "feature_fields": feature_fields,
        "item_num": item_num,
        "emb_size": E,
    }

    tied_embs = {}
    dense_by_dim = {}
    for f, (dim, act) in enumerate(feature_fields):
        if act:
            tied_embs[f] = nrm((dim, E)).astype(jnp.bfloat16)    # shared in/out
        else:
            dense_by_dim.setdefault(dim, []).append(
                (f, nrm((dim, E)), nrm((E,)), nrm((E, dim)), nrm((dim,))))
    params["tied_embs"] = tied_embs

    in_groups, out_groups = [], []
    for dim, entries in dense_by_dim.items():
        fs = [e[0] for e in entries]
        in_groups.append({
            "fields": fs, "dim": dim,
            "w": jnp.stack([e[1] for e in entries]),                    # (G,dim,E)
            "b": jnp.stack([e[2].reshape(1, E) for e in entries]),      # (G,1,E)
        })
        out_groups.append({
            "fields": fs, "dim": dim,
            "w": jnp.stack([e[3] for e in entries]),                    # (G,E,dim)
            "b": jnp.stack([e[4].reshape(1, dim) for e in entries]),    # (G,1,dim)
        })
    params["in_dense_groups"] = in_groups
    params["out_dense_groups"] = out_groups

    layer_list = []
    for _ in range(layer_num):
        layer_list.append(dict(
            w_qkv=nrm((E, 3 * E)).astype(jnp.bfloat16), b_qkv=nrm((1, 3 * E)),
            wo=nrm((E, E)).astype(jnp.bfloat16), bo=nrm((1, E)),
            ln1_g=jnp.ones((1, E), jnp.float32), ln1_b=jnp.zeros((1, E), jnp.float32),
            w1=nrm((E, 4 * E)).astype(jnp.bfloat16), b1=nrm((1, 4 * E)),
            w2=nrm((4 * E, E)).astype(jnp.bfloat16), b2=nrm((1, E)),
            ln2_g=jnp.ones((1, E), jnp.float32), ln2_b=jnp.zeros((1, E), jnp.float32),
        ))
    params["enc"] = {k: jnp.stack([ld[k] for ld in layer_list])
                     for k in layer_list[0]}
    return params


# ----------------------------------------------------------------------------
# MIIRS forward
# ----------------------------------------------------------------------------
def miirs_forward(params, input_session_ids, session_feature_fields, padding_mask):
    E = params["emb_size"]
    ff = params["feature_fields"]
    F = len(ff) + 1
    B, S = input_session_ids.shape
    M = B * S

    # ---- per-field input projections -> (M, E) each ----
    field_vecs = [None] * F
    # item embedding gather (glue); padded rows are never indexed (ids < item_num)
    field_vecs[0] = params["item_emb"][input_session_ids].reshape(M, E).astype(jnp.float32)

    zero_bias_e = jnp.zeros((E,), jnp.float32)
    # TODO(synk): when a 'softmax' field is known one-hot this matmul could be a
    # gather; kept as a general dense projection to preserve module semantics.
    for f, (dim, act) in enumerate(ff):
        if act:  # einsum('ijl,lk->ijk', feat, emb_weight)
            x2d = session_feature_fields[f].reshape(M, dim)
            field_vecs[f + 1] = linear_full(x2d, params["tied_embs"][f], zero_bias_e)
    for grp in params["in_dense_groups"]:   # nn.Linear(dim -> E), batched per dim
        dim = grp["dim"]
        xs = jnp.stack([session_feature_fields[f].reshape(M, dim)
                        for f in grp["fields"]], axis=0)
        outs = linear_stacked(xs, grp["w"], grp["b"])            # (G, M, E)
        for i, f in enumerate(grp["fields"]):
            field_vecs[f + 1] = outs[i]

    x = jnp.stack(field_vecs, axis=1).reshape(B, S, F, E)        # (B, S, F, E)
    x = x + params["pos_emb"][:S][None, :, None, :]
    x = x + params["field_emb"][None, None, :, :]
    x = x.reshape(B, S * F, E)

    pad = jnp.repeat(padding_mask.astype(jnp.float32)[:, :, None], F, axis=2)
    pad = pad.reshape(B, S * F)

    # ---- fused transformer encoder stack (all layers in one pallas_call) ----
    x = encoder_stack(x, pad, params["enc"], num_heads=4)

    temps = x.reshape(B, S, F, E).transpose(2, 0, 1, 3)          # (F, B, S, E)

    # ---- per-field output projections ----
    outputs = [None] * F
    out0 = tied_output_proj(temps[0].reshape(M, E), params["item_emb"],
                            params["item_num"])
    outputs[0] = out0.reshape(B, S, params["item_num"])
    for f, (dim, act) in enumerate(ff):
        if act:  # einsum('ijk,lk->ijl', temps, emb_weight)  (tied, no bias)
            o = tied_output_proj(temps[f + 1].reshape(M, E),
                                 params["tied_embs"][f], dim)
            outputs[f + 1] = o.reshape(B, S, dim)
    for grp in params["out_dense_groups"]:   # nn.Linear(E -> dim), batched per dim
        dim = grp["dim"]
        xs = jnp.stack([temps[f + 1].reshape(M, E) for f in grp["fields"]], axis=0)
        outs = linear_stacked(xs, grp["w"], grp["b"])            # (G, M, dim)
        for i, f in enumerate(grp["fields"]):
            outputs[f + 1] = outs[i].reshape(B, S, dim)
    return outputs


# ----------------------------------------------------------------------------
if __name__ == "__main__":
    key = jax.random.PRNGKey(0)
    dataset = "tg"
    emb_size = 64
    layer_num = 3
    B, S = 2, 8

    kp, kdata = jax.random.split(key)
    params = init_params(kp, dataset=dataset, emb_size=emb_size, layer_num=layer_num)
    item_num, feature_fields = DATASET_CONFIGS[dataset]

    ks = jax.random.split(kdata, len(feature_fields) + 1)
    input_session_ids = jax.random.randint(ks[0], (B, S), 0, item_num)
    session_feature_fields = []
    for f, (dim, act) in enumerate(feature_fields):
        kf = ks[f + 1]
        if act == "sigmoid":     # multi-hot binary field
            feat = (jax.random.uniform(kf, (B, S, dim)) < 0.01).astype(jnp.float32)
        elif act == "softmax":   # one-hot field
            idx = jax.random.randint(kf, (B, S), 0, dim)
            feat = jax.nn.one_hot(idx, dim, dtype=jnp.float32)
        else:                    # dense (e.g. BERT) feature
            feat = jax.random.normal(kf, (B, S, dim), jnp.float32)
        session_feature_fields.append(feat)

    # True == padded position (PyTorch src_key_padding_mask convention)
    padding_mask = jnp.zeros((B, S), dtype=bool).at[:, S - 2:].set(True)

    outputs = miirs_forward(params, input_session_ids,
                            session_feature_fields, padding_mask)
    outputs = jax.block_until_ready(outputs)

    assert outputs[0].shape == (B, S, item_num)
    for f, (dim, _) in enumerate(feature_fields):
        assert outputs[f + 1].shape == (B, S, dim)
    assert all(bool(jnp.all(jnp.isfinite(o))) for o in outputs)
    print("KERNEL_OK")
</pallas_src>

<mosaic_0001>
module attributes {stable_mosaic.version = 11 : i64} {
  func.func @_linear_kernel(%arg0: i32, %arg1: memref<16x958xf32, #tpu.memory_space<vmem>>, %arg2: memref<958x64xbf16, #tpu.memory_space<vmem>>, %arg3: memref<1x64xf32, #tpu.memory_space<vmem>>, %arg4: memref<16x64xf32, #tpu.memory_space<vmem>>) attributes {dimension_semantics = [#tpu.dimension_semantics<arbitrary>], iteration_bounds = array<i64: 1>, scalar_prefetch = 0 : i64, scratch_operands = 0 : i64, tpu.core_type = #tpu.core_type<tc>, window_params = [{pipeline_mode = #tpu.pipeline_mode<synchronous>, transform_indices = @transform_0, window_bounds = array<i64: 16, 958>}, {pipeline_mode = #tpu.pipeline_mode<synchronous>, transform_indices = @transform_1, window_bounds = array<i64: 958, 64>}, {pipeline_mode = #tpu.pipeline_mode<synchronous>, transform_indices = @transform_2, window_bounds = array<i64: 1, 64>}, {pipeline_mode = #tpu.pipeline_mode<synchronous>, transform_indices = @transform_3, window_bounds = array<i64: 16, 64>}]} {
    %c0 = arith.constant 0 : index
    %c0_0 = arith.constant 0 : index
    %0 = vector.load %arg2[%c0, %c0_0] : memref<958x64xbf16, #tpu.memory_space<vmem>>, vector<958x64xbf16>
    %c0_1 = arith.constant 0 : index
    %c0_2 = arith.constant 0 : index
    %1 = vector.load %arg1[%c0_1, %c0_2] : memref<16x958xf32, #tpu.memory_space<vmem>>, vector<16x958xf32>
    %2 = arith.truncf %1 : vector<16x958xf32> to vector<16x958xbf16>
    %cst = arith.constant dense<0.000000e+00> : vector<16x64xf32>
    %3 = tpu.matmul %2, %0, %cst {dimension_numbers = #tpu.dot_dimension_numbers<[1], [0], [0], [1], [0, 0, 1, 1], [], []>} : vector<16x958xbf16>, vector<958x64xbf16>, vector<16x64xf32> -> vector<16x64xf32>
    %c0_3 = arith.constant 0 : index
    %c0_4 = arith.constant 0 : index
    %4 = vector.load %arg3[%c0_3, %c0_4] : memref<1x64xf32, #tpu.memory_space<vmem>>, vector<1x64xf32>
    %5 = vector.broadcast %4 : vector<1x64xf32> to vector<16x64xf32>
    %6 = arith.addf %3, %5 : vector<16x64xf32>
    %c0_5 = arith.constant 0 : index
    %c0_6 = arith.constant 0 : index
    %7 = vector.load %arg4[%c0_5, %c0_6] : memref<16x64xf32, #tpu.memory_space<vmem>>, vector<16x64xf32>
    tpu.vector_store %arg4[%c0_5, %c0_6], %6 {strides = array<i32>} : memref<16x64xf32, #tpu.memory_space<vmem>>, vector<16x64xf32>,
    return
  }
  func.func @transform_0(%arg0: i32) -> (i32, i32) {
    %c0_i32 = arith.constant 0 : i32
    %c0_i32_0 = arith.constant 0 : i32
    %c0_i32_1 = arith.constant 0 : i32
    return %c0_i32, %c0_i32_0 : i32, i32
  }
  func.func @transform_1(%arg0: i32) -> (i32, i32) {
    %c0_i32 = arith.constant 0 : i32
    %c0_i32_0 = arith.constant 0 : i32
    %c0_i32_1 = arith.constant 0 : i32
    return %c0_i32, %c0_i32_0 : i32, i32
  }
  func.func @transform_2(%arg0: i32) -> (i32, i32) {
    %c0_i32 = arith.constant 0 : i32
    %c0_i32_0 = arith.constant 0 : i32
    %c0_i32_1 = arith.constant 0 : i32
    return %c0_i32, %c0_i32_0 : i32, i32
  }
  func.func @transform_3(%arg0: i32) -> (i32, i32) {
    %c0_i32 = arith.constant 0 : i32
    %c0_i32_0 = arith.constant 0 : i32
    %c0_i32_1 = arith.constant 0 : i32
    return %c0_i32, %c0_i32_0 : i32, i32
  }
}

</mosaic_0001>

<bundles_post_ra>
// kernel: tpu_custom_call.1
= control target key start
LH: loop header
LB: loop body
LE: loop exit
PB: predicated region body
PF: predicated region fallthrough
CT: control target
= control target key end

     0   :  { %v931_v43 = vmov 0   ;;  %vm526_vm0 = vcmask 506880   ;;  %vm530_vm1 = vcmask 1046528   ;;  %s1201_s0 = inlined_call_operand.vmem [shape: f32[16,958], index: 0, kind: input, shape index: {}]   ;;  %s1202_s1 = inlined_call_operand.vmem [shape: bf16[958,64], index: 1, kind: input, shape index: {}]   ;;  %s1203_s2 = inlined_call_operand.vmem [shape: f32[1,64], index: 2, kind: input, shape index: {}]   ;;  %s1204_s3 = inlined_call_operand.hbm [shape: f32[16,64], index: 3, kind: output, shape index: {}]  }
   0x1   :  { %v849_v0 = vld [vmem:[%s1202_s1 + $0x78] sm:$0xff]   ;;  %v853_v4 = vld [vmem:[%s1202_s1 + $0x70] sm:$0xff]   ;;  %v857_v8 = vld [vmem:[%s1202_s1 + $0x68] sm:$0xff]  }
   0x2   :  { %v850_v1 = vld [vmem:[%s1202_s1 + $0xf8] sm:$0xff]   ;;  %779 = vmatprep.subr.bf16.mxu0 %v849_v0  ;;  %v854_v5 = vld [vmem:[%s1202_s1 + $0xf0] sm:$0xff]   ;;  %v858_v9 = vld [vmem:[%s1202_s1 + $0xe8] sm:$0xff]  }
   0x3   :  { %v851_v2 = vld [vmem:[%s1202_s1 + $0x38] sm:$0xff]   ;;  %801 = vmatprep.subr.bf16.mxu1 %v850_v1  ;;  %v855_v6 = vld [vmem:[%s1202_s1 + $0x30] sm:$0xff]   ;;  %v859_v10 = vld [vmem:[%s1202_s1 + $0x28] sm:$0xff]  }
   0x4   :  { %v852_v3 = vld [vmem:[%s1202_s1 + $0xb8] sm:$0xff]   ;;  %780 = vmatpush3.bf16.msra.mxu0 %v851_v2  ;;  %v856_v7 = vld [vmem:[%s1202_s1 + $0xb0] sm:$0xff]   ;;  %v860_v11 = vld [vmem:[%s1202_s1 + $0xa8] sm:$0xff]  }
   0x5   :  { %802 = vmatpush3.bf16.msra.mxu1 %v852_v3  ;;  %781 = vmatprep.subr.bf16.mxu0 %v853_v4  ;;  %v861_v12 = vld [vmem:[%s1202_s1 + $0x60] sm:$0xff]   ;;  %v865_v16 = vld [vmem:[%s1202_s1 + $0x58] sm:$0xff]   ;;  %v869_v20 = vld [vmem:[%s1202_s1 + $0x50] sm:$0xff]  }
   0x6   :  { %803 = vmatprep.subr.bf16.mxu1 %v854_v5  ;;  %v862_v13 = vld [vmem:[%s1202_s1 + $0xe0] sm:$0xff]   ;;  %v866_v17 = vld [vmem:[%s1202_s1 + $0xd8] sm:$0xff]   ;;  %v870_v21 = vld [vmem:[%s1202_s1 + $0xd0] sm:$0xff]  }
   0x7   :  { %v863_v14 = vld [vmem:[%s1202_s1 + $0x20] sm:$0xff]   ;;  %v867_v18 = vld [vmem:[%s1202_s1 + $0x18] sm:$0xff]   ;;  %v871_v22 = vld [vmem:[%s1202_s1 + $0x10] sm:$0xff]  }
   0x8   :  { %782 = vmatpush3.bf16.msra.mxu0 %v855_v6  ;;  %v864_v15 = vld [vmem:[%s1202_s1 + $0xa0] sm:$0xff]   ;;  %v868_v19 = vld [vmem:[%s1202_s1 + $0x98] sm:$0xff]   ;;  %v872_v23 = vld [vmem:[%s1202_s1 + $0x90] sm:$0xff]  }
   0x9   :  { %804 = vmatpush3.bf16.msra.mxu1 %v856_v7  ;;  %783 = vmatprep.subr.bf16.mxu0 %v857_v8  ;;  %v873_v24 = vld [vmem:[%s1202_s1 + $0x48] sm:$0xff]   ;;  %v877_v28 = vld [vmem:[%s1202_s1 + $0x40] sm:$0xff]   ;;  %v139_v34 = vld [vmem:[%s1201_s0 + $0x18] sm:$0xff] }
   0xa   :  { %805 = vmatprep.subr.bf16.mxu1 %v858_v9  ;;  %v874_v25 = vld [vmem:[%s1202_s1 + $0xc8] sm:$0xff]   ;;  %v878_v29 = vld [vmem:[%s1202_s1 + $0xc0] sm:$0xff]   ;;  %v147_v36 = vld [vmem:[%s1201_s0 + $0x58] sm:$0xff] }
   0xb   :  { %v875_v26 = vld [vmem:[%s1202_s1 + $0x8] sm:$0xff]   ;;  %v879_v30 = vld [vmem:[%s1202_s1] sm:$0xff]   ;;  %v155_v39 = vpack.c.bf16 %v147_v36, %v139_v34  ;;  %v138_v41 = vld [vmem:[%s1201_s0 + $0x10] sm:$0xff] }
   0xc   :  { %784 = vmatpush3.bf16.msra.mxu0 %v859_v10  ;;  %v876_v27 = vld [vmem:[%s1202_s1 + $0x88] sm:$0xff]   ;;  %v880_v31 = vld [vmem:[%s1202_s1 + $0x80] sm:$0xff]   ;;  %v146_v42 = vld [vmem:[%s1201_s0 + $0x50] sm:$0xff] }
   0xd   :  { %806 = vmatpush3.bf16.msra.mxu1 %v860_v11  ;;  %785 = vmatprep.subr.bf16.mxu0 %v861_v12  ;;  %v137_v32 = vld [vmem:[%s1201_s0 + $0x8] sm:$0xff]  ;;  %v136_v37 = vld [vmem:[%s1201_s0] sm:$0xff]  ;;  %v154_v44 = vpack.c.bf16 %v146_v42, %v138_v41  ;;  %v881_v45 = vld [vmem:[%s1202_s1 + $0x178] sm:$0xff]  }
   0xe   :  { %807 = vmatprep.subr.bf16.mxu1 %v862_v13  ;;  %v145_v33 = vld [vmem:[%s1201_s0 + $0x48] sm:$0xff]  ;;  %v144_v38 = vld [vmem:[%s1201_s0 + $0x40] sm:$0xff]  ;;  %607 = vmatprep.mubr.bf16.mxu1 %v155_v39  ;;  %v882_v46 = vld [vmem:[%s1202_s1 + $0x138] sm:$0xff]  }
   0xf   :  { %v153_v35 = vpack.c.bf16 %v145_v33, %v137_v32  ;;  %v152_v40 = vpack.c.bf16 %v144_v38, %v136_v37  ;;  %v883_v47 = vld [vmem:[%s1202_s1 + $0x1b8] sm:$0xff]   ;;  %v884_v48 = vld [vmem:[%s1202_s1 + $0x170] sm:$0xff]   ;;  %v887_v51 = vld [vmem:[%s1202_s1 + $0x168] sm:$0xff]  }
  0x10   :  { %786 = vmatpush3.bf16.msra.mxu0 %v863_v14  ;;  %v885_v49 = vld [vmem:[%s1202_s1 + $0x130] sm:$0xff]   ;;  %v888_v52 = vld [vmem:[%s1202_s1 + $0x128] sm:$0xff]   ;;  %v890_v54 = vld [vmem:[%s1202_s1 + $0x160] sm:$0xff]  }
  0x11   :  { %808 = vmatpush3.bf16.msra.mxu1 %v864_v15  ;;  %787 = vmatprep.subr.bf16.mxu0 %v865_v16  ;;  %v886_v50 = vld [vmem:[%s1202_s1 + $0x1b0] sm:$0xff]   ;;  %v889_v53 = vld [vmem:[%s1202_s1 + $0x1a8] sm:$0xff]   ;;  %v891_v55 = vld [vmem:[%s1202_s1 + $0x120] sm:$0xff]  }
  0x12   :  { %809 = vmatprep.subr.bf16.mxu1 %v866_v17  ;;  %566 = vmatprep.mubr.bf16.mxu0 %v153_v35  ;;  %v892_v56 = vld [vmem:[%s1202_s1 + $0x1a0] sm:$0xff]   ;;  %v893_v57 = vld [vmem:[%s1202_s1 + $0x158] sm:$0xff]   ;;  %v896_v60 = vld [vmem:[%s1202_s1 + $0x150] sm:$0xff]  }
  0x13   :  { %v894_v58 = vld [vmem:[%s1202_s1 + $0x118] sm:$0xff]   ;;  %v897_v61 = vld [vmem:[%s1202_s1 + $0x110] sm:$0xff]   ;;  %v899_v63 = vld [vmem:[%s1202_s1 + $0x148] sm:$0xff]  }
  0x14   :  { %788 = vmatpush3.bf16.msra.mxu0 %v867_v18  ;;  %v895_v59 = vld [vmem:[%s1202_s1 + $0x198] sm:$0xff]   ;;  %v898_v62 = vld [vmem:[%s1202_s1 + $0x190] sm:$0xff]   ;;  %v900_v0 = vld [vmem:[%s1202_s1 + $0x108] sm:$0xff]  }
  0x15   :  { %810 = vmatpush3.bf16.msra.mxu1 %v868_v19  ;;  %789 = vmatprep.subr.bf16.mxu0 %v869_v20  ;;  %v141_v1 = vld [vmem:[%s1201_s0 + $0x28] sm:$0xff]  ;;  %v902_v3 = vld [vmem:[%s1202_s1 + $0x140] sm:$0xff]   ;;  %v905_v10 = vld [vmem:[%s1202_s1 + $0x1d8] sm:$0x7f]  }
  0x16   :  { %811 = vmatprep.subr.bf16.mxu1 %v870_v21  ;;  %v901_v2 = vld [vmem:[%s1202_s1 + $0x188] sm:$0xff]   ;;  %v903_v5 = vld [vmem:[%s1202_s1 + $0x100] sm:$0xff]   ;;  %v143_v11 = vld [vmem:[%s1201_s0 + $0x38] sm:$0xff] }
  0x17   :  { %v149_v4 = vld [vmem:[%s1201_s0 + $0x68] sm:$0xff]  ;;  %v140_v7 = vld [vmem:[%s1201_s0 + $0x20] sm:$0xff]  ;;  %v151_v12 = vld [vmem:[%s1201_s0 + $0x78] sm:$0xff] }
  0x18   :  { %790 = vmatpush3.bf16.msra.mxu0 %v871_v22  ;;  %v157_v6 = vpack.c.bf16 %v149_v4, %v141_v1  ;;  %v148_v8 = vld [vmem:[%s1201_s0 + $0x60] sm:$0xff]  ;;  %v159_v14 = vpack.c.bf16 %v151_v12, %v143_v11 }
  0x19   :  { %812 = vmatpush3.bf16.msra.mxu1 %v872_v23  ;;  %791 = vmatprep.subr.bf16.mxu0 %v873_v24  ;;  %v904_v9 = vld [vmem:[%s1202_s1 + $0x180] sm:$0xff]   ;;  %v156_v13 = vpack.c.bf16 %v148_v8, %v140_v7 }
  0x1a   :  { %813 = vmatprep.subr.bf16.mxu1 %v874_v25 }
  0x1c   :  { %792 = vmatpush3.bf16.msra.mxu0 %v875_v26 }
  0x1d   :  { %814 = vmatpush3.bf16.msra.mxu1 %v876_v27  ;;  %793 = vmatprep.subr.bf16.mxu0 %v877_v28 }
  0x1e   :  { %815 = vmatprep.subr.bf16.mxu1 %v878_v29 }
  0x20   :  { %794 = vmatpush3.bf16.msra.mxu0 %v879_v30 }
  0x21   :  { %816 = vmatpush3.bf16.msra.mxu1 %v880_v31  ;;  %823 = vmatprep.subr.bf16.mxu0 %v881_v45 }
  0x22   :  { %657 = vmatprep.subr.bf16.mxu1 %v931_v43 }
  0x23   :  { %567 = vmatmul.mubr.bf16.vlgmr.msra.gmra.mxu0 %v152_v40 }
  0x24   :  { %608 = vmatmul.mubr.bf16.vlgmr.msra.gmra.mxu1 %v154_v44  ;;  %824 = vmatpush3.bf16.msra.mxu0 %v882_v46 }
  0x25   :  { %658 = vmatpush1.bf16.msra.mxu1 %v883_v47  ;;  %825 = vmatprep.subr.bf16.mxu0 %v884_v48 }
  0x26   :  { %659 = vmatprep.subr.bf16.mxu1 %v931_v43  ;;  %648 = vmatprep.mubr.bf16.mxu0 %v157_v6 }
  0x28   :  { %826 = vmatpush3.bf16.msra.mxu0 %v885_v49 }
  0x29   :  { %660 = vmatpush1.bf16.msra.mxu1 %v886_v50  ;;  %827 = vmatprep.subr.bf16.mxu0 %v887_v51 }
  0x2a   :  { %661 = vmatprep.subr.bf16.mxu1 %v931_v43 }
  0x2c   :  { %828 = vmatpush3.bf16.msra.mxu0 %v888_v52 }
  0x2d   :  { %662 = vmatpush1.bf16.msra.mxu1 %v889_v53  ;;  %829 = vmatprep.subr.bf16.mxu0 %v890_v54 }
  0x2e   :  { %663 = vmatprep.subr.bf16.mxu1 %v931_v43 }
  0x30   :  { %830 = vmatpush3.bf16.msra.mxu0 %v891_v55 }
  0x31   :  { %664 = vmatpush1.bf16.msra.mxu1 %v892_v56  ;;  %831 = vmatprep.subr.bf16.mxu0 %v893_v57 }
  0x32   :  { %665 = vmatprep.subr.bf16.mxu1 %v931_v43 }
  0x34   :  { %832 = vmatpush3.bf16.msra.mxu0 %v894_v58 }
  0x35   :  { %666 = vmatpush1.bf16.msra.mxu1 %v895_v59  ;;  %833 = vmatprep.subr.bf16.mxu0 %v896_v60 }
  0x36   :  { %667 = vmatprep.subr.bf16.mxu1 %v931_v43 }
  0x38   :  { %834 = vmatpush3.bf16.msra.mxu0 %v897_v61 }
  0x39   :  { %668 = vmatpush1.bf16.msra.mxu1 %v898_v62  ;;  %835 = vmatprep.subr.bf16.mxu0 %v899_v63 }
  0x3a   :  { %669 = vmatprep.subr.bf16.mxu1 %v931_v43 }
  0x3c   :  { %836 = vmatpush3.bf16.msra.mxu0 %v900_v0 }
  0x3d   :  { %670 = vmatpush1.bf16.msra.mxu1 %v901_v2  ;;  %837 = vmatprep.subr.bf16.mxu0 %v902_v3 }
  0x3e   :  { %671 = vmatprep.subr.bf16.mxu1 %v931_v43 }
  0x3f   :  { %8 = vsyncpa [#allocation3], 0  ;;  %778 = vmatprep.mubr.msk.bf16.mxu1 %vm526_vm0, %v159_v14  ;;  %v532_v15 = vsel %vm530_vm1, %v905_v10, 0  ;;  %v906_v16 = vld [vmem:[%s1202_s1 + $0x1d0] sm:$0xff]   ;;  %v907_v17 = vld [vmem:[%s1202_s1 + $0x1c8] sm:$0xff]   ;;  %vm698_vm2 = vcmask 523264  }
  0x40   :  { %838 = vmatpush3.bf16.msra.mxu0 %v903_v5  ;;  %v908_v18 = vld [vmem:[%s1202_s1 + $0x1c0] sm:$0xff]   ;;  %v142_v19 = vld [vmem:[%s1201_s0 + $0x30] sm:$0xff] }
  0x41   :  { %672 = vmatpush1.bf16.msra.mxu1 %v904_v9  ;;  %v150_v20 = vld [vmem:[%s1201_s0 + $0x70] sm:$0xff]  ;;  %v717_v31 = vld [vmem:[%s1203_s2] ss:$0 sm:$0xff]  ;;  %s932_s0 = smov [#allocation2]  }
  0x42   :  { %681 = vmatprep.subr.bf16.mxu1 %v931_v43  ;;  %v158_v21 = vpack.c.bf16 %v150_v20, %v142_v19  ;;  %s706_s30 = sshll.u32 %s932_s0, 4  ;;  %s707_s30 = int_to_ptr.vmem [resolvable:$true] %s706_s30 }
  0x43   :  { %649 = vmatmul.mubr.bf16.vlgmr.msra.gmra.mxu0 %v156_v13  ;;  %s909_s2 = scalar_lea.vmem %s707_s30, 256  ;;  %p914_p1 = scmp.lt.s32.totalorder %s707_s30, %s707_s30 }
  0x44   :  { %p910_p0 = scmp.ne.s32.totalorder %s707_s30, %s909_s2  ;;  %p915_p2 = scmp.lt.s32.totalorder %s909_s2, %s909_s2 }
  0x45   :  { %682 = vmatpush2.bf16.msra.mxu1 %v532_v15 }
  0x46   :  { %683 = vmatprep.subr.bf16.mxu1 %v931_v43  ;;  %p916_p3 = por %p915_p2, %p914_p1 }
  0x48   :  { %p917_p4 = pnand %p916_p3, %p910_p0 }
  0x49   :  { %684 = vmatpush2.bf16.msra.mxu1 %v906_v16 }
  0x4a   :  { %685 = vmatprep.subr.bf16.mxu1 %v931_v43 }
  0x4d   :  { %686 = vmatpush2.bf16.msra.mxu1 %v907_v17 }
  0x4e   :  { %687 = vmatprep.subr.bf16.mxu1 %v931_v43 }
  0x51   :  { %688 = vmatpush2.bf16.msra.mxu1 %v908_v18 }
  0x54   :  { %690 = vmatmul.mubr.bf16.vlgmr.msra.gmra.mxu1 %v158_v21 }
  0xe3   :  { %v795_v22 = vpop.f32.mrf.mxu0 }
  0xe4   :  { %v817_v26 = vpop.f32.mrf.mxu1 }
  0xe5   :  { %v796_v23 = vpop.f32.mrf.mxu0 }
  0xe6   :  { %v818_v28 = vpop.f32.mrf.mxu1  ;;  %v797_v30 = vadd.f32 %v796_v23, %v795_v22 }
  0xe7   :  { %v798_v24 = vpop.f32.mrf.mxu0  ;;  %v819_v36 = vadd.f32 %v818_v28, %v817_v26 }
  0xe8   :  { %v820_v32 = vpop.f32.mrf.mxu1  ;;  %v569_v34 = vadd.f32 %v797_v30, %v717_v31 }
  0xe9   :  { %v799_v25 = vpop.f32.mrf.mxu0 }
  0xea   :  { %v800_v35 = vadd.f32 %v799_v25, %v798_v24  ;;  %v821_v38 = vpop.f32.mrf.mxu1  ;;  %v610_v40 = vadd.f32 %v819_v36, %v569_v34 }
  0xeb   :  { %v822_v42 = vadd.f32 %v821_v38, %v820_v32 }
  0xec   :  { %v572_v41 = vadd.f32 %v800_v35, %v717_v31 }
  0xee   :  { %v613_v46 = vadd.f32 %v822_v42, %v572_v41 }
 0x103   :  { %v839_v27 = vpop.f32.mrf.mxu0 }
 0x105   :  { %v840_v29 = vpop.f32.mrf.mxu0 }
 0x106   :  { %v841_v37 = vadd.f32 %v840_v29, %v839_v27 }
 0x107   :  { %v842_v33 = vpop.f32.mrf.mxu0 }
 0x108   :  { %v651_v44 = vadd.f32 %v841_v37, %v610_v40 }
 0x109   :  { %v843_v39 = vpop.f32.mrf.mxu0 }
 0x10a   :  { %v844_v43 = vadd.f32 %v843_v39, %v842_v33 }
 0x10c   :  { %v654_v49 = vadd.f32 %v844_v43, %v613_v46 }
 0x114   :  { %v691_v45 = vpop.f32.mrf.mxu1 }
 0x115   :  { %v692_v47 = vadd.f32 %v691_v45, %v651_v44 }
 0x116   :  { %v693_v48 = vpop.f32.mrf.mxu1 }
 0x117   :  { %699 = vst.msk [vmem:[#allocation2] sm:$0xff] %vm698_vm2, %v692_v47 }
 0x118   :  { %v694_v50 = vpop.f32.mrf.mxu1 }
 0x119   :  { %v695_v51 = vadd.f32 %v694_v50, %v654_v49 }
 0x11a   :  { %v696_v52 = vpop.f32.mrf.mxu1 }
 0x11b   :  { %700 = vst.msk [vmem:[#allocation2 + $0x8] sm:$0xff] %vm698_vm2, %v695_v51 }
 0x11c   :  { %920 = shalt.err (!%p917_p4)
}
 0x11d   :  { %s933_s4 = smov 128   ;;  %s934_s5 = smov 8  }
 0x11e   :  { %712 = dma.vmem_to_hbm [thread:$0]  %s707_s30, 256, %s1204_s3, [#allocation3], %s933_s4, %s933_s4, %s934_s5  }
 0x11f   :  { %929 = dma.done.wait [#allocation3], 256  }
 0x120   :  { %930 = vsyncadd [#allocation3], 4294967040 }
 0x121   :  { %716 = vsyncpa [#allocation3], 1 }

</bundles_post_ra>
